<compile_context>
chip_gen: v6e
topology: v6e:2x2x1
jax: 0.10.0
libtpu: 0.0.40
codegen_flags: <defaults>
</compile_context>

<pallas_src>
import functools

import jax
import jax.numpy as jnp
from jax.experimental import pallas as pl
from jax.experimental.pallas import tpu as pltpu

_MIB = 1024 * 1024


def _round_up(x, m):
    return ((x + m - 1) // m) * m


def _pad2d(a, rows, cols):
    pr, pc = rows - a.shape[0], cols - a.shape[1]
    if pr or pc:
        a = jnp.pad(a, ((0, pr), (0, pc)))
    return a


def _vmem_budget_bytes():
    """Generation-aware scoped-VMEM budget (leave headroom for compiler scratch)."""
    try:
        cap = int(pltpu.get_tpu_info().vmem_capacity_bytes)
    except Exception:  # query unavailable -> assume the smallest (v7x 64 MiB/TC)
        cap = 64 * _MIB
    # v7x (64 MiB/TC) -> 40 MiB; v5e/v6e (128 MiB) -> 100 MiB.
    return max(min(cap - 24 * _MIB, 100 * _MIB), 32 * _MIB)


# ----------------------------------------------------------------------------
# Kernels
# ----------------------------------------------------------------------------
def _ffn_kernel_resident(x_ref, w1_ref, b1_ref, w2_ref, b2_ref, o_ref):
    # Weights use a constant block index across the whole grid, so they are
    # DMA'd from HBM exactly once and stay VMEM-resident for every row tile.
    x = x_ref[...]
    h = jnp.dot(x, w1_ref[...], preferred_element_type=jnp.float32)
    h = jnp.maximum(h + b1_ref[...].astype(jnp.float32), 0.0)  # bias + ReLU (VPU)
    # dropout == identity at inference
    h = h.astype(x.dtype)  # full-rate bf16 MXU for bf16 inputs (no-op for f32)
    y = jnp.dot(h, w2_ref[...], preferred_element_type=jnp.float32)
    o_ref[...] = (y + b2_ref[...].astype(jnp.float32)).astype(o_ref.dtype)


def _ffn_kernel_tiled(x_ref, w1_ref, b1_ref, w2_ref, b2_ref, o_ref, acc_ref):
    # x_ref:  (TM, DMp)   row tile       w1_ref: (DMp, TF)  W1 column block
    # b1_ref: (1, TF)                    w2_ref: (TF, DMp)  W2 row block
    # b2_ref: (1, DMp)                   o_ref:  (TM, DMp)  resident across j
    j = pl.program_id(1)

    @pl.when(j == 0)
    def _():
        # Fold the second bias into the accumulator init.
        acc_ref[...] = jnp.broadcast_to(
            b2_ref[...].astype(jnp.float32), acc_ref.shape
        )

    x = x_ref[...]
    h = jnp.dot(x, w1_ref[...], preferred_element_type=jnp.float32)
    h = jnp.maximum(h + b1_ref[...].astype(jnp.float32), 0.0)
    # dropout == identity at inference
    h = h.astype(x.dtype)
    acc_ref[...] += jnp.dot(h, w2_ref[...], preferred_element_type=jnp.float32)

    @pl.when(j == pl.num_programs(1) - 1)
    def _():
        o_ref[...] = acc_ref[...].astype(o_ref.dtype)


# ----------------------------------------------------------------------------
# Wrapper
# ----------------------------------------------------------------------------
@functools.partial(jax.jit, static_argnames=("tile_m", "tile_ff", "force_tiled"))
def positionwise_ffn(x, w1, b1, w2, b2, *, tile_m=512, tile_ff=2048,
                     force_tiled=False):
    """x: (batch, seq, d_model) -> (batch, seq, d_model).

    Weights are stored transposed relative to PyTorch: (in_features, out_features).
    """
    batch, seq, d_model = x.shape
    d_ff = w1.shape[1]
    n = batch * seq

    itemsize = jnp.dtype(x.dtype).itemsize
    w_itemsize = jnp.dtype(w1.dtype).itemsize
    budget = _vmem_budget_bytes()

    dm_p = _round_up(d_model, 128)   # lane-aligned d_model
    dff_p = _round_up(d_ff, 128)     # lane-aligned d_ff

    # ---- row tile: clamp to row count, shrink if trailing padding > ~25% ----
    tm = min(tile_m, _round_up(n, 16))
    while tm > 64 and (_round_up(n, tm) - n) * 4 > _round_up(n, tm):
        tm //= 2
    tm = max(tm, 16)

    # ---- weight-resident path feasibility (count double buffers) ------------
    def resident_bytes(tm_):
        return (
            2 * tm_ * dm_p * itemsize                           # x tile
            + 2 * tm_ * dm_p * itemsize                         # out tile
            + 2 * (dm_p * dff_p + dff_p * dm_p) * w_itemsize    # W1 + W2
            + 2 * (dff_p + dm_p) * w_itemsize                   # biases
            + tm_ * dff_p * (4 + itemsize)                      # f32 h (+ cast)
        )

    tm_res = tm
    while tm_res > 64 and resident_bytes(tm_res) > budget:
        tm_res //= 2
    use_resident = (not force_tiled) and resident_bytes(tm_res) <= budget

    if use_resident:
        tm = tm_res
        n_p = _round_up(n, tm)
        x2d = _pad2d(x.reshape(n, d_model), n_p, dm_p)
        w1_p = _pad2d(w1, dm_p, dff_p)
        b1_p = _pad2d(b1.reshape(1, d_ff), 1, dff_p)
        w2_p = _pad2d(w2, dff_p, dm_p)
        b2_p = _pad2d(b2.reshape(1, d_model), 1, dm_p)

        cost = pl.CostEstimate(
            flops=4 * n_p * dm_p * dff_p,
            transcendentals=0,
            bytes_accessed=(
                (x2d.size + n_p * dm_p) * itemsize
                + (w1_p.size + w2_p.size + b1_p.size + b2_p.size) * w_itemsize
            ),
        )

        out = pl.pallas_call(
            _ffn_kernel_resident,
            out_shape=jax.ShapeDtypeStruct((n_p, dm_p), x.dtype),
            grid_spec=pltpu.PrefetchScalarGridSpec(
                num_scalar_prefetch=0,
                grid=(n_p // tm,),
                in_specs=[
                    pl.BlockSpec((tm, dm_p), lambda i: (i, 0)),      # x row tile
                    pl.BlockSpec((dm_p, dff_p), lambda i: (0, 0)),   # W1 (resident)
                    pl.BlockSpec((1, dff_p), lambda i: (0, 0)),      # b1 (resident)
                    pl.BlockSpec((dff_p, dm_p), lambda i: (0, 0)),   # W2 (resident)
                    pl.BlockSpec((1, dm_p), lambda i: (0, 0)),       # b2 (resident)
                ],
                out_specs=pl.BlockSpec((tm, dm_p), lambda i: (i, 0)),
            ),
            compiler_params=pltpu.CompilerParams(
                dimension_semantics=("parallel",),   # row tiles shard across TCs
                vmem_limit_bytes=budget,
            ),
            cost_estimate=cost,
        )(x2d, w1_p, b1_p, w2_p, b2_p)
        return out[:n, :d_model].reshape(batch, seq, d_model)

    # ---- d_ff-tiled fallback: accumulate over the reduction axis ------------
    tf = min(_round_up(tile_ff, 128), dff_p)

    def tiled_bytes(tm_, tf_):
        return (
            2 * tm_ * dm_p * itemsize                         # x tile
            + 2 * tm_ * dm_p * itemsize                       # out tile
            + 2 * (dm_p * tf_ + tf_ * dm_p) * w_itemsize      # W1 col + W2 row blocks
            + 2 * (tf_ + dm_p) * w_itemsize                   # b1 slice + b2
            + tm_ * dm_p * 4                                  # f32 accumulator
            + tm_ * tf_ * (4 + itemsize)                      # intermediate h
        )

    while tiled_bytes(tm, tf) > budget and tf > 128:
        new_tf = max(128, _round_up(tf // 2, 128))
        if new_tf == tf:
            break
        tf = new_tf
    while tiled_bytes(tm, tf) > budget and tm > 64:
        tm //= 2

    dff_pt = _round_up(d_ff, tf)
    n_p = _round_up(n, tm)

    x2d = _pad2d(x.reshape(n, d_model), n_p, dm_p)
    w1_p = _pad2d(w1, dm_p, dff_pt)
    b1_p = _pad2d(b1.reshape(1, d_ff), 1, dff_pt)
    w2_p = _pad2d(w2, dff_pt, dm_p)
    b2_p = _pad2d(b2.reshape(1, d_model), 1, dm_p)

    n_row_tiles = n_p // tm
    cost = pl.CostEstimate(
        flops=4 * n_p * dm_p * dff_pt,
        transcendentals=0,
        bytes_accessed=(
            (x2d.size + n_p * dm_p) * itemsize
            # weights / b1 are re-streamed once per row tile in this scheme
            + n_row_tiles * (w1_p.size + w2_p.size + b1_p.size) * w_itemsize
            + b2_p.size * w_itemsize
        ),
    )

    out = pl.pallas_call(
        _ffn_kernel_tiled,
        out_shape=jax.ShapeDtypeStruct((n_p, dm_p), x.dtype),
        grid_spec=pltpu.PrefetchScalarGridSpec(
            num_scalar_prefetch=0,
            grid=(n_row_tiles, dff_pt // tf),   # rows (parallel), d_ff (arbitrary)
            in_specs=[
                pl.BlockSpec((tm, dm_p), lambda i, j: (i, 0)),    # x row tile
                pl.BlockSpec((dm_p, tf), lambda i, j: (0, j)),    # W1 column block
                pl.BlockSpec((1, tf), lambda i, j: (0, j)),       # b1 slice
                pl.BlockSpec((tf, dm_p), lambda i, j: (j, 0)),    # W2 row block
                pl.BlockSpec((1, dm_p), lambda i, j: (0, 0)),     # b2 (full)
            ],
            # Same output block across the d_ff axis -> accumulator semantics.
            out_specs=pl.BlockSpec((tm, dm_p), lambda i, j: (i, 0)),
            scratch_shapes=[pltpu.VMEM((tm, dm_p), jnp.float32)],
        ),
        compiler_params=pltpu.CompilerParams(
            dimension_semantics=("parallel", "arbitrary"),
            vmem_limit_bytes=budget,
        ),
        cost_estimate=cost,
    )(x2d, w1_p, b1_p, w2_p, b2_p)

    return out[:n, :d_model].reshape(batch, seq, d_model)


# ----------------------------------------------------------------------------
# Params / reference / tests
# ----------------------------------------------------------------------------
def init_params(key, d_model, d_ff, dtype=jnp.float32):
    """Deterministic init mimicking nn.Linear (uniform +-1/sqrt(fan_in)).

    Weights are stored transposed relative to PyTorch: (in, out).
    """
    k1, k2, k3, k4 = jax.random.split(key, 4)
    bound1 = 1.0 / (d_model ** 0.5)
    bound2 = 1.0 / (d_ff ** 0.5)
    w1 = jax.random.uniform(k1, (d_model, d_ff), dtype, -bound1, bound1)
    b1 = jax.random.uniform(k2, (d_ff,), dtype, -bound1, bound1)
    w2 = jax.random.uniform(k3, (d_ff, d_model), dtype, -bound2, bound2)
    b2 = jax.random.uniform(k4, (d_model,), dtype, -bound2, bound2)
    return w1, b1, w2, b2


def _reference(x, w1, b1, w2, b2):
    return jnp.maximum(x @ w1 + b1, 0.0) @ w2 + b2


if __name__ == "__main__":
    key = jax.random.PRNGKey(0)
    kx, kp, kx2, kp2, kx3 = jax.random.split(key, 5)

    # --- primary small-shape test (module's toy config; weight-resident path)
    batch, seq, d_model, d_ff = 2, 8, 32, 64
    x = jax.random.normal(kx, (batch, seq, d_model), jnp.float32)
    w1, b1, w2, b2 = init_params(kp, d_model, d_ff)
    y = jax.block_until_ready(positionwise_ffn(x, w1, b1, w2, b2))
    ref = _reference(x, w1, b1, w2, b2)
    assert y.shape == (batch, seq, d_model)
    assert jnp.allclose(y, ref, atol=1e-4, rtol=1e-4), "mismatch (resident, small)"

    # --- multi-row-tile weight-resident test (non-divisible rows, padding) ---
    b3, s3, dm3, dff3 = 2, 200, 128, 512
    x3 = jax.random.normal(kx3, (b3, s3, dm3), jnp.float32)
    p3 = init_params(kp2, dm3, dff3)
    y3 = jax.block_until_ready(positionwise_ffn(x3, *p3, tile_m=128))
    ref3 = _reference(x3, *p3)
    assert jnp.allclose(y3, ref3, atol=1e-4, rtol=1e-4), "mismatch (resident, tiled rows)"

    # --- forced d_ff-tiled path: exercises the reduction-axis accumulator ----
    b2_, s2_, dm2, dff2 = 2, 64, 128, 512
    x2 = jax.random.normal(kx2, (b2_, s2_, dm2), jnp.float32)
    p2 = init_params(kp2, dm2, dff2)
    y2 = jax.block_until_ready(
        positionwise_ffn(x2, *p2, tile_m=64, tile_ff=128, force_tiled=True))
    ref2 = _reference(x2, *p2)
    assert jnp.allclose(y2, ref2, atol=1e-4, rtol=1e-4), "mismatch (d_ff-tiled)"

    print("KERNEL_OK")
</pallas_src>

<mosaic_0001>
module attributes {stable_mosaic.version = 11 : i64} {
  func.func @_ffn_kernel_resident(%arg0: i32, %arg1: memref<16x128xf32, #tpu.memory_space<vmem>>, %arg2: memref<128x128xf32, #tpu.memory_space<vmem>>, %arg3: memref<1x128xf32, #tpu.memory_space<vmem>>, %arg4: memref<128x128xf32, #tpu.memory_space<vmem>>, %arg5: memref<1x128xf32, #tpu.memory_space<vmem>>, %arg6: memref<16x128xf32, #tpu.memory_space<vmem>>) attributes {dimension_semantics = [#tpu.dimension_semantics<parallel>], iteration_bounds = array<i64: 1>, scalar_prefetch = 0 : i64, scratch_operands = 0 : i64, tpu.core_type = #tpu.core_type<tc>, window_params = [{transform_indices = @transform_0, window_bounds = array<i64: 16, 128>}, {pipeline_mode = #tpu.pipeline_mode<synchronous>, transform_indices = @transform_1, window_bounds = array<i64: 128, 128>}, {pipeline_mode = #tpu.pipeline_mode<synchronous>, transform_indices = @transform_2, window_bounds = array<i64: 1, 128>}, {pipeline_mode = #tpu.pipeline_mode<synchronous>, transform_indices = @transform_3, window_bounds = array<i64: 128, 128>}, {pipeline_mode = #tpu.pipeline_mode<synchronous>, transform_indices = @transform_4, window_bounds = array<i64: 1, 128>}, {transform_indices = @transform_5, window_bounds = array<i64: 16, 128>}]} {
    %c0 = arith.constant 0 : index
    %c0_0 = arith.constant 0 : index
    %0 = vector.load %arg1[%c0, %c0_0] : memref<16x128xf32, #tpu.memory_space<vmem>>, vector<16x128xf32>
    %c0_1 = arith.constant 0 : index
    %c0_2 = arith.constant 0 : index
    %1 = vector.load %arg2[%c0_1, %c0_2] : memref<128x128xf32, #tpu.memory_space<vmem>>, vector<128x128xf32>
    %cst = arith.constant dense<0.000000e+00> : vector<16x128xf32>
    %2 = tpu.matmul %0, %1, %cst {dimension_numbers = #tpu.dot_dimension_numbers<[1], [0], [0], [1], [0, 0, 1, 1], [], []>} : vector<16x128xf32>, vector<128x128xf32>, vector<16x128xf32> -> vector<16x128xf32>
    %c0_3 = arith.constant 0 : index
    %c0_4 = arith.constant 0 : index
    %3 = vector.load %arg3[%c0_3, %c0_4] : memref<1x128xf32, #tpu.memory_space<vmem>>, vector<1x128xf32>
    %4 = vector.broadcast %3 : vector<1x128xf32> to vector<16x128xf32>
    %5 = arith.addf %2, %4 : vector<16x128xf32>
    %cst_5 = arith.constant 0.000000e+00 : f32
    %6 = vector.broadcast %cst_5 : f32 to vector<16x128xf32>
    %7 = arith.maximumf %5, %6 : vector<16x128xf32>
    %c0_6 = arith.constant 0 : index
    %c0_7 = arith.constant 0 : index
    %8 = vector.load %arg4[%c0_6, %c0_7] : memref<128x128xf32, #tpu.memory_space<vmem>>, vector<128x128xf32>
    %cst_8 = arith.constant dense<0.000000e+00> : vector<16x128xf32>
    %9 = tpu.matmul %7, %8, %cst_8 {dimension_numbers = #tpu.dot_dimension_numbers<[1], [0], [0], [1], [0, 0, 1, 1], [], []>} : vector<16x128xf32>, vector<128x128xf32>, vector<16x128xf32> -> vector<16x128xf32>
    %c0_9 = arith.constant 0 : index
    %c0_10 = arith.constant 0 : index
    %10 = vector.load %arg5[%c0_9, %c0_10] : memref<1x128xf32, #tpu.memory_space<vmem>>, vector<1x128xf32>
    %11 = vector.broadcast %10 : vector<1x128xf32> to vector<16x128xf32>
    %12 = arith.addf %9, %11 : vector<16x128xf32>
    %c0_11 = arith.constant 0 : index
    %c0_12 = arith.constant 0 : index
    %13 = vector.load %arg6[%c0_11, %c0_12] : memref<16x128xf32, #tpu.memory_space<vmem>>, vector<16x128xf32>
    tpu.vector_store %arg6[%c0_11, %c0_12], %12 {strides = array<i32>} : memref<16x128xf32, #tpu.memory_space<vmem>>, vector<16x128xf32>,
    return
  }
  func.func @transform_0(%arg0: i32) -> (i32, i32) {
    %c0_i32 = arith.constant 0 : i32
    %c0_i32_0 = arith.constant 0 : i32
    return %arg0, %c0_i32 : i32, i32
  }
  func.func @transform_1(%arg0: i32) -> (i32, i32) {
    %c0_i32 = arith.constant 0 : i32
    %c0_i32_0 = arith.constant 0 : i32
    %c0_i32_1 = arith.constant 0 : i32
    return %c0_i32, %c0_i32_0 : i32, i32
  }
  func.func @transform_2(%arg0: i32) -> (i32, i32) {
    %c0_i32 = arith.constant 0 : i32
    %c0_i32_0 = arith.constant 0 : i32
    %c0_i32_1 = arith.constant 0 : i32
    return %c0_i32, %c0_i32_0 : i32, i32
  }
  func.func @transform_3(%arg0: i32) -> (i32, i32) {
    %c0_i32 = arith.constant 0 : i32
    %c0_i32_0 = arith.constant 0 : i32
    %c0_i32_1 = arith.constant 0 : i32
    return %c0_i32, %c0_i32_0 : i32, i32
  }
  func.func @transform_4(%arg0: i32) -> (i32, i32) {
    %c0_i32 = arith.constant 0 : i32
    %c0_i32_0 = arith.constant 0 : i32
    %c0_i32_1 = arith.constant 0 : i32
    return %c0_i32, %c0_i32_0 : i32, i32
  }
  func.func @transform_5(%arg0: i32) -> (i32, i32) {
    %c0_i32 = arith.constant 0 : i32
    %c0_i32_0 = arith.constant 0 : i32
    return %arg0, %c0_i32 : i32, i32
  }
}

</mosaic_0001>

<bundles_post_ra>
// kernel: positionwise_ffn.1
= control target key start
LH: loop header
LB: loop body
LE: loop exit
PB: predicated region body
PF: predicated region fallthrough
CT: control target
= control target key end

     0   :  { %s478_s1 = inlined_call_operand.vmem [shape: f32[128,128], index: 1, kind: input, shape index: {}]   ;;  %s479_s0 = inlined_call_operand.vmem [shape: f32[16,128], index: 0, kind: input, shape index: {}]   ;;  %s480_s3 = inlined_call_operand.vmem [shape: f32[128,128], index: 3, kind: input, shape index: {}]   ;;  %s481_s2 = inlined_call_operand.vmem [shape: f32[1,128], index: 2, kind: input, shape index: {}]   ;;  %s482_s4 = inlined_call_operand.vmem [shape: f32[1,128], index: 4, kind: input, shape index: {}]   ;;  %s483_s5 = inlined_call_operand.vmem [shape: f32[16,128], index: 5, kind: output, shape index: {}]  }
   0x1   :  { %v37_v0 = vld [vmem:[%s478_s1 + $0x78] sm:$0xff]  ;;  %v36_v1 = vld [vmem:[%s478_s1 + $0x70] sm:$0xff]  ;;  %v35_v2 = vld [vmem:[%s478_s1 + $0x68] sm:$0xff] }
   0x2   :  { %264 = vmatprep.subr.mxu0 %v37_v0  ;;  %v34_v3 = vld [vmem:[%s478_s1 + $0x60] sm:$0xff]  ;;  %v33_v5 = vld [vmem:[%s478_s1 + $0x58] sm:$0xff]  ;;  %v136_v7 = vld [vmem:[%s480_s3 + $0x70] sm:$0xff] }
   0x3   :  { %265 = vmatpush3.msra.mxu0 %v37_v0  ;;  %v20_v4 = vld [vmem:[%s479_s0] sm:$0xff]  ;;  %v137_v6 = vld [vmem:[%s480_s3 + $0x78] sm:$0xff]  ;;  %v32_v8 = vld [vmem:[%s478_s1 + $0x50] sm:$0xff] }
   0x4   :  { %266 = vmatprep.subr.mxu0 %v36_v1  ;;  %296 = vmatprep.mubr.f32.mxu0 %v20_v4  ;;  %v135_v9 = vld [vmem:[%s480_s3 + $0x68] sm:$0xff]  ;;  %v134_v11 = vld [vmem:[%s480_s3 + $0x60] sm:$0xff]  ;;  %v133_v13 = vld [vmem:[%s480_s3 + $0x58] sm:$0xff] }
   0x5   :  { %267 = vmatpush3.msra.mxu0 %v36_v1  ;;  %299 = vmatprep.subr.mxu1 %v137_v6  ;;  %v31_v10 = vld [vmem:[%s478_s1 + $0x48] sm:$0xff]  ;;  %v30_v12 = vld [vmem:[%s478_s1 + $0x40] sm:$0xff]  ;;  %v29_v14 = vld [vmem:[%s478_s1 + $0x38] sm:$0xff] }
   0x6   :  { %268 = vmatprep.subr.mxu0 %v35_v2  ;;  %300 = vmatpush3.msra.mxu1 %v137_v6  ;;  %v132_v15 = vld [vmem:[%s480_s3 + $0x50] sm:$0xff]  ;;  %v131_v17 = vld [vmem:[%s480_s3 + $0x48] sm:$0xff]  ;;  %v130_v19 = vld [vmem:[%s480_s3 + $0x40] sm:$0xff] }
   0x7   :  { %269 = vmatpush3.msra.mxu0 %v35_v2  ;;  %301 = vmatprep.subr.mxu1 %v136_v7  ;;  %v28_v16 = vld [vmem:[%s478_s1 + $0x30] sm:$0xff]  ;;  %v27_v18 = vld [vmem:[%s478_s1 + $0x28] sm:$0xff]  ;;  %v26_v20 = vld [vmem:[%s478_s1 + $0x20] sm:$0xff] }
   0x8   :  { %270 = vmatprep.subr.mxu0 %v34_v3  ;;  %302 = vmatpush3.msra.mxu1 %v136_v7  ;;  %v129_v21 = vld [vmem:[%s480_s3 + $0x38] sm:$0xff]  ;;  %v128_v23 = vld [vmem:[%s480_s3 + $0x30] sm:$0xff]  ;;  %v127_v25 = vld [vmem:[%s480_s3 + $0x28] sm:$0xff] }
   0x9   :  { %271 = vmatpush3.msra.mxu0 %v34_v3  ;;  %303 = vmatprep.subr.mxu1 %v135_v9  ;;  %v25_v22 = vld [vmem:[%s478_s1 + $0x18] sm:$0xff]  ;;  %v24_v24 = vld [vmem:[%s478_s1 + $0x10] sm:$0xff]  ;;  %v23_v26 = vld [vmem:[%s478_s1 + $0x8] sm:$0xff] }
   0xa   :  { %272 = vmatprep.subr.mxu0 %v33_v5  ;;  %304 = vmatpush3.msra.mxu1 %v135_v9  ;;  %v126_v27 = vld [vmem:[%s480_s3 + $0x20] sm:$0xff]  ;;  %v21_v29 = vld [vmem:[%s479_s0 + $0x8] sm:$0xff]  ;;  %v125_v30 = vld [vmem:[%s480_s3 + $0x18] sm:$0xff] }
   0xb   :  { %273 = vmatpush3.msra.mxu0 %v33_v5  ;;  %305 = vmatprep.subr.mxu1 %v134_v11  ;;  %v22_v28 = vld [vmem:[%s478_s1] sm:$0xff]  ;;  %v124_v31 = vld [vmem:[%s480_s3 + $0x10] sm:$0xff]  ;;  %v123_v32 = vld [vmem:[%s480_s3 + $0x8] sm:$0xff] }
   0xc   :  { %274 = vmatprep.subr.mxu0 %v32_v8  ;;  %306 = vmatpush3.msra.mxu1 %v134_v11  ;;  %v122_v33 = vld [vmem:[%s480_s3] sm:$0xff] }
   0xd   :  { %275 = vmatpush3.msra.mxu0 %v32_v8  ;;  %307 = vmatprep.subr.mxu1 %v133_v13  ;;  %v226_v34 = vld [vmem:[%s481_s2] ss:$0 sm:$0xff] }
   0xe   :  { %276 = vmatprep.subr.mxu0 %v31_v10  ;;  %308 = vmatpush3.msra.mxu1 %v133_v13  ;;  %v227_v41 = vld [vmem:[%s482_s4] ss:$0 sm:$0xff] }
   0xf   :  { %277 = vmatpush3.msra.mxu0 %v31_v10  ;;  %309 = vmatprep.subr.mxu1 %v132_v15 }
  0x10   :  { %278 = vmatprep.subr.mxu0 %v30_v12  ;;  %310 = vmatpush3.msra.mxu1 %v132_v15 }
  0x11   :  { %279 = vmatpush3.msra.mxu0 %v30_v12  ;;  %311 = vmatprep.subr.mxu1 %v131_v17 }
  0x12   :  { %280 = vmatprep.subr.mxu0 %v29_v14  ;;  %312 = vmatpush3.msra.mxu1 %v131_v17 }
  0x13   :  { %281 = vmatpush3.msra.mxu0 %v29_v14  ;;  %313 = vmatprep.subr.mxu1 %v130_v19 }
  0x14   :  { %282 = vmatprep.subr.mxu0 %v28_v16  ;;  %314 = vmatpush3.msra.mxu1 %v130_v19 }
  0x15   :  { %283 = vmatpush3.msra.mxu0 %v28_v16  ;;  %315 = vmatprep.subr.mxu1 %v129_v21 }
  0x16   :  { %284 = vmatprep.subr.mxu0 %v27_v18  ;;  %316 = vmatpush3.msra.mxu1 %v129_v21 }
  0x17   :  { %285 = vmatpush3.msra.mxu0 %v27_v18  ;;  %317 = vmatprep.subr.mxu1 %v128_v23 }
  0x18   :  { %286 = vmatprep.subr.mxu0 %v26_v20  ;;  %318 = vmatpush3.msra.mxu1 %v128_v23 }
  0x19   :  { %287 = vmatpush3.msra.mxu0 %v26_v20  ;;  %319 = vmatprep.subr.mxu1 %v127_v25 }
  0x1a   :  { %288 = vmatprep.subr.mxu0 %v25_v22  ;;  %320 = vmatpush3.msra.mxu1 %v127_v25 }
  0x1b   :  { %289 = vmatpush3.msra.mxu0 %v25_v22  ;;  %321 = vmatprep.subr.mxu1 %v126_v27 }
  0x1c   :  { %290 = vmatprep.subr.mxu0 %v24_v24  ;;  %322 = vmatpush3.msra.mxu1 %v126_v27 }
  0x1d   :  { %291 = vmatpush3.msra.mxu0 %v24_v24  ;;  %323 = vmatprep.subr.mxu1 %v125_v30 }
  0x1e   :  { %292 = vmatprep.subr.mxu0 %v23_v26  ;;  %324 = vmatpush3.msra.mxu1 %v125_v30 }
  0x1f   :  { %293 = vmatpush3.msra.mxu0 %v23_v26  ;;  %325 = vmatprep.subr.mxu1 %v124_v31 }
  0x20   :  { %294 = vmatprep.subr.mxu0 %v22_v28  ;;  %326 = vmatpush3.msra.mxu1 %v124_v31 }
  0x21   :  { %295 = vmatpush3.msra.mxu0 %v22_v28  ;;  %327 = vmatprep.subr.mxu1 %v123_v32 }
  0x22   :  { %297 = vmatmul.mubr.f32.vlgmr.msra.gmra.mxu0 %v21_v29  ;;  %328 = vmatpush3.msra.mxu1 %v123_v32 }
  0x23   :  { %329 = vmatprep.subr.mxu1 %v122_v33 }
  0x24   :  { %330 = vmatpush3.msra.mxu1 %v122_v33 }
  0xe2   :  { %v298_v35 = vpop.f32.mrf.mxu0 }
  0xe3   :  { %v117_v36 = vadd.f32 %v298_v35, %v226_v34 }
  0xe4   :  { %v111_v37 = vpop.f32.mrf.mxu0 }
  0xe5   :  { %v112_v38 = vadd.f32 %v226_v34, %v111_v37  ;;  %v121_v40 = vmax.f32 %v117_v36, 0.0 }
  0xe7   :  { %v120_v39 = vmax.f32 %v112_v38, 0.0 }
  0xe9   :  { %331 = vmatprep.mubr.f32.mxu1 %v120_v39 }
  0xea   :  { %332 = vmatmul.mubr.f32.vlgmr.msra.gmra.mxu1 %v121_v40 }
 0x1aa   :  { %v333_v42 = vpop.f32.mrf.mxu1 }
 0x1ab   :  { %v217_v43 = vadd.f32 %v333_v42, %v227_v41 }
 0x1ac   :  { %v211_v44 = vpop.f32.mrf.mxu1 }
 0x1ad   :  { %221 = vst [vmem:[%s483_s5 + $0x8] sm:$0xff] %v217_v43  ;;  %v212_v45 = vadd.f32 %v227_v41, %v211_v44 }
 0x1af   :  { %220 = vst [vmem:[%s483_s5] sm:$0xff] %v212_v45 }

</bundles_post_ra>
